<compile_context>
chip_gen: v5e
topology: v5e:2x2
jax: 0.10.0
libtpu: 0.0.40
codegen_flags: <defaults>
</compile_context>

<pallas_src>
import functools

import jax
import jax.numpy as jnp
from jax.experimental import pallas as pl
from jax.experimental.pallas import tpu as pltpu


def _round_up(n: int, m: int) -> int:
    return ((n + m - 1) // m) * m


def mlp_kernel(x_ref, w1_ref, b1_ref, w2_ref, b2_ref, o_ref, *, d_out):
    compute_dtype = w1_ref.dtype  # weights are already pre-cast; no per-step cast
    # hidden = relu(x @ W1 + b1); MXU accumulates in f32.
    x = x_ref[...].astype(compute_dtype)
    h = jnp.dot(x, w1_ref[...], preferred_element_type=jnp.float32)
    h = jnp.maximum(h + b1_ref[...], 0.0)  # bias-add + ReLU stay in f32
    # out = hidden @ W2 + b2
    o = jnp.dot(h.astype(compute_dtype), w2_ref[...],
                preferred_element_type=jnp.float32)
    o = o + b2_ref[...]
    # Store only the real output features (value slice is cheap); out_shape is
    # unpadded (B, d_out) so the HBM writeback is not padded-lane amplified.
    o_ref[...] = o[:, :d_out].astype(o_ref.dtype)
    # TODO(synk): dropout=True branch of the module is not implemented; this is
    # the default dropout=False forward path.


def prepare_params(w1, b1, w2, b2, *, compute_dtype=jnp.bfloat16):
    """One-time parameter prep (NOT per forward call).

    * Zero-pads the hidden and weight-side output dims to lane multiples (128)
      so both matmuls are lane-aligned.  Zero padding is exact: padded hidden
      columns are relu(0+0)=0 and hit zero rows of the padded W2; padded
      output columns are sliced away inside the kernel before the store.
    * Pre-casts W1/W2 to the MXU compute dtype (bf16 by default) so the kernel
      never re-casts resident weights and their VMEM/HBM footprint is halved.
      Biases stay f32 for the f32 epilogue.  Pass compute_dtype=jnp.float32
      for bit-tight semantics.
    """
    d_in, h = w1.shape
    h2, d_out = w2.shape
    assert h2 == h and b1.shape == (1, h) and b2.shape == (1, d_out)
    hp = _round_up(h, 128)
    op = _round_up(d_out, 128)
    w1p = jnp.zeros((d_in, hp), compute_dtype).at[:, :h].set(
        w1.astype(compute_dtype))
    b1p = jnp.zeros((1, hp), jnp.float32).at[:, :h].set(b1.astype(jnp.float32))
    w2p = jnp.zeros((hp, op), compute_dtype).at[:h, :d_out].set(
        w2.astype(compute_dtype))
    b2p = jnp.zeros((1, op), jnp.float32).at[:, :d_out].set(
        b2.astype(jnp.float32))
    return (w1p, b1p, w2p, b2p), d_out


def mlp_forward(x, padded_params, d_out, *, block_batch=512):
    """Fused MLP forward as a single batch-tiled Pallas kernel.

    Batch tiling: fewest / biggest / balanced tiles (per-grid-step overhead
    ~0.35us dominates at these shapes) without copying or padding x in HBM.
    The last block may be ragged: Pallas masks the out-of-bounds output rows
    on store; the undefined x rows read there only produce rows that are
    discarded.  On v7x pick block_batch so large batches give >=2 tiles so
    both TensorCores get work.
    """
    w1p, b1p, w2p, b2p = padded_params
    B, d_in = x.shape
    hp = w1p.shape[1]
    op = w2p.shape[1]
    assert w1p.shape == (d_in, hp) and w2p.shape == (hp, op)
    assert b1p.shape == (1, hp) and b2p.shape == (1, op)

    # Balanced batch tile: multiple of 8 sublanes, ~<= block_batch rows, sized
    # so the ragged-tile waste is small.
    n_tiles = max(1, pl.cdiv(B, block_batch))
    tb = _round_up(pl.cdiv(B, n_tiles), 8)
    grid = (pl.cdiv(B, tb),)

    w_item = jnp.dtype(w1p.dtype).itemsize
    x_item = jnp.dtype(x.dtype).itemsize
    flops = 2 * B * d_in * hp + 2 * B * hp * op
    bytes_accessed = (x_item * B * d_in                 # x read
                      + w_item * (d_in * hp + hp * op)  # weights (bf16)
                      + 4 * (hp + op)                   # biases (f32)
                      + x_item * B * d_out)             # unpadded output write

    return pl.pallas_call(
        functools.partial(mlp_kernel, d_out=d_out),
        out_shape=jax.ShapeDtypeStruct((B, d_out), x.dtype),
        grid_spec=pltpu.PrefetchScalarGridSpec(
            num_scalar_prefetch=0,
            grid=grid,
            in_specs=[
                # x: one batch tile per grid step (double-buffered by Pallas).
                pl.BlockSpec((tb, d_in), lambda i: (i, 0)),
                # Weights / biases: constant block index -> fetched once and
                # kept resident in VMEM for the whole grid.
                # TODO(synk): for large hidden/output widths on v7x (64 MiB
                # VMEM), add pipeline_mode=pl.Buffered(1) on these specs (or
                # K-tile the weights) so they are not double-buffered.
                pl.BlockSpec((d_in, hp), lambda i: (0, 0)),
                pl.BlockSpec((1, hp), lambda i: (0, 0)),
                pl.BlockSpec((hp, op), lambda i: (0, 0)),
                pl.BlockSpec((1, op), lambda i: (0, 0)),
            ],
            # Unpadded output tile: no padded-lane writeback, no post-call
            # feature slice.
            out_specs=pl.BlockSpec((tb, d_out), lambda i: (i, 0)),
        ),
        compiler_params=pltpu.CompilerParams(
            # Batch tiles are independent -> shard across TCs on v7x.
            dimension_semantics=("parallel",),
            # No explicit vmem_limit_bytes: actual usage here is <1 MiB, far
            # under the default scoped limit on v5e/v6e/v7x.
        ),
        cost_estimate=pl.CostEstimate(
            flops=flops, transcendentals=0, bytes_accessed=bytes_accessed),
    )(x, w1p, b1p, w2p, b2p)


def init_mlp_params(key, input_dimension, hidden_dimension, output_dimension):
    """Deterministic init mimicking PyTorch nn.Linear (uniform +/-1/sqrt(fan_in))."""
    k1, k2, k3, k4 = jax.random.split(key, 4)
    bound1 = 1.0 / jnp.sqrt(jnp.float32(input_dimension))
    bound2 = 1.0 / jnp.sqrt(jnp.float32(hidden_dimension))
    w1 = jax.random.uniform(k1, (input_dimension, hidden_dimension),
                            jnp.float32, -bound1, bound1)
    b1 = jax.random.uniform(k2, (1, hidden_dimension),
                            jnp.float32, -bound1, bound1)
    w2 = jax.random.uniform(k3, (hidden_dimension, output_dimension),
                            jnp.float32, -bound2, bound2)
    b2 = jax.random.uniform(k4, (1, output_dimension),
                            jnp.float32, -bound2, bound2)
    return w1, b1, w2, b2


def _reference(x, w1, b1, w2, b2):
    return jnp.maximum(x @ w1 + b1, 0.0) @ w2 + b2


if __name__ == "__main__":
    # Small shapes consistent with the module: input=16, hidden=32, output=4.
    input_dim, hidden_dim, output_dim = 16, 32, 4

    key = jax.random.PRNGKey(0)
    kx1, kx2, kp = jax.random.split(key, 3)
    w1, b1, w2, b2 = init_mlp_params(kp, input_dim, hidden_dim, output_dim)

    # --- Case 1: tiny batch, f32 weights/compute -> bit-tight check. --------
    params_f32, d_out = prepare_params(w1, b1, w2, b2,
                                       compute_dtype=jnp.float32)
    x_small = jax.random.normal(kx1, (8, input_dim), dtype=jnp.float32)
    out_small = mlp_forward(x_small, params_f32, d_out)
    out_small = jax.block_until_ready(out_small)
    ref_small = _reference(x_small, w1, b1, w2, b2)
    assert out_small.shape == (8, output_dim)
    assert jnp.allclose(out_small, ref_small, atol=1e-5, rtol=1e-5), (
        "f32 path mismatch")

    # --- Case 2: multi-tile batch with a ragged last tile (no jnp.pad) using
    #     the bf16 MXU fast path (v6e/v7x peak; also fine on v5e MXU). -------
    params_bf16, d_out = prepare_params(w1, b1, w2, b2,
                                        compute_dtype=jnp.bfloat16)
    x_big = jax.random.normal(kx2, (300, input_dim), dtype=jnp.float32)
    out_big = mlp_forward(x_big, params_bf16, d_out, block_batch=128)
    out_big = jax.block_until_ready(out_big)
    ref_big = _reference(x_big, w1, b1, w2, b2)
    assert out_big.shape == (300, output_dim)
    # bf16 inputs / f32 accumulate -> looser tolerance than pure f32.
    assert jnp.allclose(out_big, ref_big, atol=5e-2, rtol=5e-2), (
        "bf16 path mismatch")

    print("KERNEL_OK")
</pallas_src>

<mosaic_0001>
module attributes {stable_mosaic.version = 11 : i64} {
  func.func @mlp_kernel(%arg0: i32, %arg1: memref<8x16xf32, #tpu.memory_space<vmem>>, %arg2: memref<16x128xf32, #tpu.memory_space<vmem>>, %arg3: memref<1x128xf32, #tpu.memory_space<vmem>>, %arg4: memref<128x128xf32, #tpu.memory_space<vmem>>, %arg5: memref<1x128xf32, #tpu.memory_space<vmem>>, %arg6: memref<8x4xf32, #tpu.memory_space<vmem>>) attributes {dimension_semantics = [#tpu.dimension_semantics<parallel>], iteration_bounds = array<i64: 1>, scalar_prefetch = 0 : i64, scratch_operands = 0 : i64, tpu.core_type = #tpu.core_type<tc>, window_params = [{transform_indices = @transform_0, window_bounds = array<i64: 8, 16>}, {pipeline_mode = #tpu.pipeline_mode<synchronous>, transform_indices = @transform_1, window_bounds = array<i64: 16, 128>}, {pipeline_mode = #tpu.pipeline_mode<synchronous>, transform_indices = @transform_2, window_bounds = array<i64: 1, 128>}, {pipeline_mode = #tpu.pipeline_mode<synchronous>, transform_indices = @transform_3, window_bounds = array<i64: 128, 128>}, {pipeline_mode = #tpu.pipeline_mode<synchronous>, transform_indices = @transform_4, window_bounds = array<i64: 1, 128>}, {transform_indices = @transform_5, window_bounds = array<i64: 8, 4>}]} {
    %c0 = arith.constant 0 : index
    %c0_0 = arith.constant 0 : index
    %0 = vector.load %arg1[%c0, %c0_0] : memref<8x16xf32, #tpu.memory_space<vmem>>, vector<8x16xf32>
    %c0_1 = arith.constant 0 : index
    %c0_2 = arith.constant 0 : index
    %1 = vector.load %arg2[%c0_1, %c0_2] : memref<16x128xf32, #tpu.memory_space<vmem>>, vector<16x128xf32>
    %cst = arith.constant dense<0.000000e+00> : vector<8x128xf32>
    %2 = tpu.matmul %0, %1, %cst {dimension_numbers = #tpu.dot_dimension_numbers<[1], [0], [0], [1], [0, 0, 1, 1], [], []>} : vector<8x16xf32>, vector<16x128xf32>, vector<8x128xf32> -> vector<8x128xf32>
    %c0_3 = arith.constant 0 : index
    %c0_4 = arith.constant 0 : index
    %3 = vector.load %arg3[%c0_3, %c0_4] : memref<1x128xf32, #tpu.memory_space<vmem>>, vector<1x128xf32>
    %4 = vector.broadcast %3 : vector<1x128xf32> to vector<8x128xf32>
    %5 = arith.addf %2, %4 : vector<8x128xf32>
    %cst_5 = arith.constant 0.000000e+00 : f32
    %6 = vector.broadcast %cst_5 : f32 to vector<8x128xf32>
    %7 = arith.maximumf %5, %6 : vector<8x128xf32>
    %c0_6 = arith.constant 0 : index
    %c0_7 = arith.constant 0 : index
    %8 = vector.load %arg4[%c0_6, %c0_7] : memref<128x128xf32, #tpu.memory_space<vmem>>, vector<128x128xf32>
    %cst_8 = arith.constant dense<0.000000e+00> : vector<8x128xf32>
    %9 = tpu.matmul %7, %8, %cst_8 {dimension_numbers = #tpu.dot_dimension_numbers<[1], [0], [0], [1], [0, 0, 1, 1], [], []>} : vector<8x128xf32>, vector<128x128xf32>, vector<8x128xf32> -> vector<8x128xf32>
    %c0_9 = arith.constant 0 : index
    %c0_10 = arith.constant 0 : index
    %10 = vector.load %arg5[%c0_9, %c0_10] : memref<1x128xf32, #tpu.memory_space<vmem>>, vector<1x128xf32>
    %11 = vector.broadcast %10 : vector<1x128xf32> to vector<8x128xf32>
    %12 = arith.addf %9, %11 : vector<8x128xf32>
    %13 = vector.extract_strided_slice %12 {offsets = [0, 0], sizes = [8, 4], strides = [1, 1]} : vector<8x128xf32> to vector<8x4xf32>
    %c0_11 = arith.constant 0 : index
    %c0_12 = arith.constant 0 : index
    %14 = vector.load %arg6[%c0_11, %c0_12] : memref<8x4xf32, #tpu.memory_space<vmem>>, vector<8x4xf32>
    tpu.vector_store %arg6[%c0_11, %c0_12], %13 {strides = array<i32>} : memref<8x4xf32, #tpu.memory_space<vmem>>, vector<8x4xf32>,
    return
  }
  func.func @transform_0(%arg0: i32) -> (i32, i32) {
    %c0_i32 = arith.constant 0 : i32
    %c0_i32_0 = arith.constant 0 : i32
    return %arg0, %c0_i32 : i32, i32
  }
  func.func @transform_1(%arg0: i32) -> (i32, i32) {
    %c0_i32 = arith.constant 0 : i32
    %c0_i32_0 = arith.constant 0 : i32
    %c0_i32_1 = arith.constant 0 : i32
    return %c0_i32, %c0_i32_0 : i32, i32
  }
  func.func @transform_2(%arg0: i32) -> (i32, i32) {
    %c0_i32 = arith.constant 0 : i32
    %c0_i32_0 = arith.constant 0 : i32
    %c0_i32_1 = arith.constant 0 : i32
    return %c0_i32, %c0_i32_0 : i32, i32
  }
  func.func @transform_3(%arg0: i32) -> (i32, i32) {
    %c0_i32 = arith.constant 0 : i32
    %c0_i32_0 = arith.constant 0 : i32
    %c0_i32_1 = arith.constant 0 : i32
    return %c0_i32, %c0_i32_0 : i32, i32
  }
  func.func @transform_4(%arg0: i32) -> (i32, i32) {
    %c0_i32 = arith.constant 0 : i32
    %c0_i32_0 = arith.constant 0 : i32
    %c0_i32_1 = arith.constant 0 : i32
    return %c0_i32, %c0_i32_0 : i32, i32
  }
  func.func @transform_5(%arg0: i32) -> (i32, i32) {
    %c0_i32 = arith.constant 0 : i32
    %c0_i32_0 = arith.constant 0 : i32
    return %arg0, %c0_i32 : i32, i32
  }
}

</mosaic_0001>

<bundles_post_ra>
// kernel: tpu_custom_call.1
= control target key start
LH: loop header
LB: loop body
LE: loop exit
PB: predicated region body
PF: predicated region fallthrough
CT: control target
= control target key end

     0   :  { %10 = vsyncpa [#allocation3], 0  ;;  %s282_s0 = inlined_call_operand.hbm [shape: f32[8,16], index: 0, kind: input, shape index: {}]   ;;  %s283_s1 = inlined_call_operand.hbm [shape: f32[16,128], index: 1, kind: input, shape index: {}]   ;;  %s284_s2 = inlined_call_operand.vmem [shape: f32[1,128], index: 2, kind: input, shape index: {}]   ;;  %s285_s3 = inlined_call_operand.hbm [shape: f32[128,128], index: 3, kind: input, shape index: {}]   ;;  %s286_s4 = inlined_call_operand.vmem [shape: f32[1,128], index: 4, kind: input, shape index: {}]   ;;  %s287_s5 = inlined_call_operand.vmem [shape: f32[8,4], index: 5, kind: output, shape index: {}]  }
   0x1   :  { %11 = vsyncpa [#allocation5], 0  ;;  %s27_s20 = sshll.u32 %s283_s1, 4  ;;  %s229_s21 = smov [#allocation4]   ;;  %s28_s20 = int_to_ptr.hbm [resolvable:$true] %s27_s20 }
   0x2   :  { %s29_s22 = sshll.u32 %s229_s21, 4  ;;  %s17_s25 = sshll.u32 %s282_s0, 4  ;;  %s30_s22 = int_to_ptr.vmem [resolvable:$true] %s29_s22  ;;  %s18_s25 = int_to_ptr.hbm [resolvable:$true] %s17_s25 }
   0x3   :  { %s230_s26 = smov 128   ;;  %s231_s27 = smov 8  }
   0x4   :  { %35 = dma.hbm_to_vmem [thread:$0]  %s28_s20, 256, %s30_s22, [#allocation5], %s230_s26, %s230_s26, %s231_s27  }
   0x5   :  { %s232_s28 = smov [#allocation2]   ;;  %s42_s7 = sshll.u32 %s285_s3, 4  ;;  %s43_s7 = int_to_ptr.hbm [resolvable:$true] %s42_s7 }
   0x6   :  { %s19_s29 = sshll.u32 %s232_s28, 4  ;;  %s233_s1 = smov [#allocation6]   ;;  %s20_s29 = int_to_ptr.vmem [resolvable:$true] %s19_s29 }
   0x7   :  { %22 = dma.hbm_to_vmem [thread:$0]  %s18_s25, 128, %s20_s29, [#allocation3]  }
   0x8   :  { %s44_s8 = sshll.u32 %s233_s1, 4  ;;  %s45_s8 = int_to_ptr.vmem [resolvable:$true] %s44_s8 }
   0x9   :  { %50 = dma.hbm_to_vmem [thread:$0]  %s43_s7, 2048, %s45_s8, [#allocation5], %s230_s26, %s230_s26, %s231_s27  }
   0xa   :  { %225 = dma.done.wait [#allocation3], 128  }
   0xb   :  { %226 = vsyncadd [#allocation3], 4294967168 }
   0xc   :  { %227 = dma.done.wait [#allocation5], 2304  }
   0xd   :  { %228 = vsyncadd [#allocation5], 4294964992  ;;  %v67_v0 = vld [vmem:[#allocation4 + $0x8] sm:$0xff]  ;;  %v66_v1 = vld [vmem:[#allocation4] sm:$0xff]  ;;  %vm72_vm0 = vcmask 130048   ;;  %vm137_vm1 = vcmask 31744  }
   0xe   :  { %90 = vmatpush.msra.mxu0 %v67_v0  ;;  %v65_v2 = vld [vmem:[#allocation2] sm:$0xff]  ;;  %v112_v3 = vld [vmem:[#allocation6 + $0x78] sm:$0xff]  ;;  %v111_v4 = vld [vmem:[#allocation6 + $0x70] sm:$0xff] }
   0xf   :  { %117 = vmatpush.msra.mxu1 %v112_v3  ;;  %v110_v5 = vld [vmem:[#allocation6 + $0x68] sm:$0xff]  ;;  %v109_v6 = vld [vmem:[#allocation6 + $0x60] sm:$0xff]  ;;  %v108_v7 = vld [vmem:[#allocation6 + $0x58] sm:$0xff] }
  0x10   :  { %91 = vmatpush.msra.mxu0 %v66_v1  ;;  %v107_v8 = vld [vmem:[#allocation6 + $0x50] sm:$0xff]  ;;  %v106_v9 = vld [vmem:[#allocation6 + $0x48] sm:$0xff]  ;;  %v105_v10 = vld [vmem:[#allocation6 + $0x40] sm:$0xff] }
  0x11   :  { %145 = vmatmul.msk.f32.vlgmr.msra.gmra.mxu0 %vm72_vm0, %v65_v2  ;;  %118 = vmatpush.msra.mxu1 %v111_v4  ;;  %v104_v11 = vld [vmem:[#allocation6 + $0x38] sm:$0xff]  ;;  %v103_v12 = vld [vmem:[#allocation6 + $0x30] sm:$0xff]  ;;  %v102_v13 = vld [vmem:[#allocation6 + $0x28] sm:$0xff] }
  0x12   :  { %v101_v14 = vld [vmem:[#allocation6 + $0x20] sm:$0xff]  ;;  %v100_v15 = vld [vmem:[#allocation6 + $0x18] sm:$0xff]  ;;  %v99_v16 = vld [vmem:[#allocation6 + $0x10] sm:$0xff] }
  0x13   :  { %119 = vmatpush.msra.mxu1 %v110_v5  ;;  %v98_v17 = vld [vmem:[#allocation6 + $0x8] sm:$0xff]  ;;  %v97_v18 = vld [vmem:[#allocation6] sm:$0xff] }
  0x14   :  { %v151_v19 = vld [vmem:[%s284_s2] ss:$0 sm:$0xff] }
  0x15   :  { %120 = vmatpush.msra.mxu1 %v109_v6  ;;  %v152_v23 = vld [vmem:[%s286_s4] ss:$0 sm:$0xff] }
  0x17   :  { %121 = vmatpush.msra.mxu1 %v108_v7 }
  0x19   :  { %122 = vmatpush.msra.mxu1 %v107_v8 }
  0x1b   :  { %123 = vmatpush.msra.mxu1 %v106_v9 }
  0x1d   :  { %124 = vmatpush.msra.mxu1 %v105_v10 }
  0x1f   :  { %125 = vmatpush.msra.mxu1 %v104_v11 }
  0x21   :  { %126 = vmatpush.msra.mxu1 %v103_v12 }
  0x23   :  { %127 = vmatpush.msra.mxu1 %v102_v13 }
  0x25   :  { %128 = vmatpush.msra.mxu1 %v101_v14 }
  0x27   :  { %129 = vmatpush.msra.mxu1 %v100_v15 }
  0x29   :  { %130 = vmatpush.msra.mxu1 %v99_v16 }
  0x2b   :  { %131 = vmatpush.msra.mxu1 %v98_v17 }
  0x2d   :  { %132 = vmatpush.msra.mxu1 %v97_v18 }
  0x8e   :  { %v93_v20 = vpop.f32.mrf.mxu0 }
  0x8f   :  { %v94_v21 = vadd.f32 %v151_v19, %v93_v20 }
  0x91   :  { %v96_v22 = vmax.f32 %v94_v21, 0.0 }
  0x93   :  { %133 = vmatmul.f32.vlgmr.msra.gmra.mxu1 %v96_v22 }
 0x110   :  { %v134_v24 = vpop.f32.mrf.mxu1 }
 0x111   :  { %v135_v25 = vadd.f32 %v152_v23, %v134_v24 }
 0x113   :  { %138 = vst.msk [vmem:[%s287_s5] sm:$0xff] %vm137_vm1, %v135_v25 }
 0x114   :  { %143 = vsyncpa [#allocation3], 1 }
 0x115   :  { %144 = vsyncpa [#allocation5], 1 }

</bundles_post_ra>
